<compile_context>
chip_gen: v7x
topology: tpu7x:2x2x1
jax: 0.10.0
libtpu: 0.0.40
codegen_flags: <defaults>
</compile_context>

<pallas_src>
import jax
import jax.numpy as jnp
from jax.experimental import pallas as pl
from jax.experimental.pallas import tpu as pltpu

IN_DIM = 1568
HID_DIM = 1024
OUT_DIM = 2
OUT_PAD = 128        # lane-dense padded fc2 output width (multiple of 128)
TILE_B_MAX = 256     # max batch tile (fills v6e/v7x 256-wide MXU M dim)
N_HID_SPLIT = 4      # hidden-dim pipeline depth when there is a single batch tile


def discriminator_kernel(x_ref, w1_ref, b1_ref, w2_ref, b2_ref, o_ref, acc_ref):
    n = pl.program_id(1)

    @pl.when(n == 0)
    def _():
        acc_ref[...] = jnp.zeros_like(acc_ref)

    # fc1 chunk: x read as f32 and cast to bf16 on the VPU (hidden under MXU/DMA),
    # f32 accumulation on the MXU.
    x_bf = x_ref[...].astype(jnp.bfloat16)
    h = jnp.dot(x_bf, w1_ref[...], preferred_element_type=jnp.float32)
    h = jnp.maximum(h + b1_ref[...], 0.0)                 # bias + ReLU
    # Dropout(0.5) is identity in eval mode.
    # TODO(synk): training-mode dropout (pltpu.prng_seed + prng_random_bits mask, 2x scale).

    # fc2 chunk (module's -0.5 scale pre-folded into w2/b2); accumulate over hidden chunks.
    acc_ref[...] += jnp.dot(h.astype(jnp.bfloat16), w2_ref[...],
                            preferred_element_type=jnp.float32)

    @pl.when(n == pl.num_programs(1) - 1)
    def _():
        o_ref[...] = (acc_ref[...] + b2_ref[...]).astype(o_ref.dtype)


def prepare_params(w1_torch, b1_torch, w2_torch, b2_torch):
    """Convert PyTorch-layout Linear params into kernel-ready arrays (done once).

    - fc1 weight transposed to (in, out) and cast to bf16 (halves HBM traffic).
    - fc2 weight/bias pre-scaled by -0.5 (the module's output scale), zero-padded to
      128 output lanes (lane-dense matmul + unmasked store); fc2 weight is bf16.
    """
    w1 = w1_torch.T.astype(jnp.bfloat16)                              # (1568, 1024) bf16
    b1 = b1_torch.reshape(1, HID_DIM).astype(jnp.float32)             # (1, 1024) f32
    w2 = -0.5 * w2_torch.T                                            # (1024, 2)
    w2p = (jnp.zeros((HID_DIM, OUT_PAD), jnp.float32)
           .at[:, :OUT_DIM].set(w2).astype(jnp.bfloat16))             # (1024, 128) bf16
    b2 = -0.5 * b2_torch
    b2p = jnp.zeros((1, OUT_PAD), jnp.float32).at[0, :OUT_DIM].set(b2)
    return w1, b1, w2p, b2p


def _tiling(batch):
    """Pick (tile_b, padded_batch) so padding copies of x are avoided when possible."""
    if batch <= TILE_B_MAX:
        tile_b = max(8, -(-batch // 8) * 8)      # single tile, pads at most 7 rows
        return tile_b, tile_b
    for t in (256, 128):                         # tile divides the batch -> no pad at all
        if batch % t == 0:
            return t, batch
    # Ragged large batch: pad up to the next tile multiple.
    # TODO(synk): in-kernel tail masking (scalar-prefetch B) to avoid this copy for huge
    #             ragged deployment batches.
    b_pad = -(-batch // TILE_B_MAX) * TILE_B_MAX
    return TILE_B_MAX, b_pad


@jax.jit
def discriminator_forward(feature, w1, b1, w2p, b2p):
    B = feature.shape[0]
    tile_b, b_pad = _tiling(B)
    n_tiles = b_pad // tile_b

    x = feature                                   # stays f32; cast happens in-kernel
    if b_pad != B:
        x = jnp.pad(x, ((0, b_pad - B), (0, 0)))

    # Single batch tile: split the hidden dim so the w1 fetch pipelines with compute.
    # Multiple batch tiles: keep w1 fully VMEM-resident (fetched from HBM exactly once).
    n_hid = N_HID_SPLIT if n_tiles == 1 else 1
    tn = HID_DIM // n_hid

    flops = 2 * b_pad * (IN_DIM * HID_DIM + HID_DIM * OUT_PAD)
    bytes_accessed = (x.size * 4 + w1.size * 2 + b1.size * 4
                      + w2p.size * 2 + b2p.size * 4 + b_pad * OUT_PAD * 4)

    out_padded = pl.pallas_call(
        discriminator_kernel,
        out_shape=jax.ShapeDtypeStruct((b_pad, OUT_PAD), jnp.float32),
        grid_spec=pltpu.PrefetchScalarGridSpec(
            num_scalar_prefetch=0,
            grid=(n_tiles, n_hid),
            in_specs=[
                pl.BlockSpec((tile_b, IN_DIM), lambda i, n: (i, 0)),   # x (f32), tiled over batch
                pl.BlockSpec((IN_DIM, tn), lambda i, n: (0, n)),       # w1 (bf16), hidden-chunked
                pl.BlockSpec((1, tn), lambda i, n: (0, n)),            # b1 (f32)
                pl.BlockSpec((tn, OUT_PAD), lambda i, n: (n, 0)),      # w2 (bf16, -0.5 folded, padded)
                pl.BlockSpec((1, OUT_PAD), lambda i, n: (0, 0)),       # b2 (f32, -0.5 folded, padded)
            ],
            out_specs=pl.BlockSpec((tile_b, OUT_PAD), lambda i, n: (i, 0)),
            scratch_shapes=[pltpu.VMEM((tile_b, OUT_PAD), jnp.float32)],   # fc2 accumulator
        ),
        compiler_params=pltpu.CompilerParams(
            dimension_semantics=("parallel", "arbitrary"),   # batch tiles shard across TCs
            vmem_limit_bytes=32 * 1024 * 1024,               # ~11 MiB actual at tile_b=256
        ),
        cost_estimate=pl.CostEstimate(
            flops=flops, transcendentals=0, bytes_accessed=bytes_accessed),
    )(x, w1, b1, w2p, b2p)

    return out_padded[:B, :OUT_DIM]


if __name__ == "__main__":
    key = jax.random.PRNGKey(0)
    k_x, k1, k2 = jax.random.split(key, 3)
    B = 2
    feature = jax.random.normal(k_x, (B, IN_DIM), dtype=jnp.float32)

    # PyTorch init: fc1.weight ~ N(0, 0.01) shape (1024, 1568), bias 0;
    #               fc2.weight ~ N(0, 0.3)  shape (2, 1024),    bias 0.
    w1_torch = 0.01 * jax.random.normal(k1, (HID_DIM, IN_DIM), dtype=jnp.float32)
    b1_torch = jnp.zeros((HID_DIM,), jnp.float32)
    w2_torch = 0.3 * jax.random.normal(k2, (OUT_DIM, HID_DIM), dtype=jnp.float32)
    b2_torch = jnp.zeros((OUT_DIM,), jnp.float32)

    w1, b1, w2p, b2p = prepare_params(w1_torch, b1_torch, w2_torch, b2_torch)

    out = discriminator_forward(feature, w1, b1, w2p, b2p)
    out = jax.block_until_ready(out)
    assert out.shape == (B, OUT_DIM)

    # Reference 1: exact PyTorch semantics in f32 (eval-mode dropout = identity).
    h_f32 = jnp.maximum(feature @ w1_torch.T + b1_torch, 0.0)
    ref_f32 = -0.5 * (h_f32 @ w2_torch.T + b2_torch)
    assert jnp.allclose(out, ref_f32, atol=5e-2, rtol=5e-2)

    # Reference 2: matches the kernel's bf16-input / f32-accumulate numerics.
    h_bf = jnp.dot(feature.astype(jnp.bfloat16), w1_torch.T.astype(jnp.bfloat16),
                   preferred_element_type=jnp.float32) + b1_torch
    h_bf = jnp.maximum(h_bf, 0.0)
    ref_bf = jnp.dot(h_bf.astype(jnp.bfloat16), w2p[:, :OUT_DIM],
                     preferred_element_type=jnp.float32) + (-0.5 * b2_torch)
    assert jnp.allclose(out, ref_bf, atol=2e-3, rtol=2e-3)

    print("KERNEL_OK")
</pallas_src>

<mosaic_0001>
module attributes {stable_mosaic.version = 11 : i64} {
  func.func @discriminator_kernel(%arg0: i32, %arg1: i32, %arg2: memref<8x1568xf32, #tpu.memory_space<vmem>>, %arg3: memref<1568x256xbf16, #tpu.memory_space<vmem>>, %arg4: memref<1x256xf32, #tpu.memory_space<vmem>>, %arg5: memref<256x128xbf16, #tpu.memory_space<vmem>>, %arg6: memref<1x128xf32, #tpu.memory_space<vmem>>, %arg7: memref<8x128xf32, #tpu.memory_space<vmem>>, %arg8: memref<8x128xf32, #tpu.memory_space<vmem>>) attributes {dimension_semantics = [#tpu.dimension_semantics<parallel>, #tpu.dimension_semantics<arbitrary>], iteration_bounds = array<i64: 1, 4>, scalar_prefetch = 0 : i64, scratch_operands = 1 : i64, tpu.core_type = #tpu.core_type<tc>, window_params = [{transform_indices = @transform_0, window_bounds = array<i64: 8, 1568>}, {transform_indices = @transform_1, window_bounds = array<i64: 1568, 256>}, {transform_indices = @transform_2, window_bounds = array<i64: 1, 256>}, {transform_indices = @transform_3, window_bounds = array<i64: 256, 128>}, {pipeline_mode = #tpu.pipeline_mode<synchronous>, transform_indices = @transform_4, window_bounds = array<i64: 1, 128>}, {transform_indices = @transform_5, window_bounds = array<i64: 8, 128>}]} {
    %c0_i32 = arith.constant 0 : i32
    %0 = arith.cmpi eq, %arg1, %c0_i32 : i32
    %1 = arith.extui %0 : i1 to i32
    %c0_i32_0 = arith.constant 0 : i32
    %2 = arith.cmpi ne, %1, %c0_i32_0 : i32
    scf.if %2 {
      %cst_15 = arith.constant 0.000000e+00 : f32
      %21 = vector.broadcast %cst_15 : f32 to vector<8x128xf32>
      %c0_16 = arith.constant 0 : index
      %c0_17 = arith.constant 0 : index
      %22 = vector.load %arg8[%c0_16, %c0_17] : memref<8x128xf32, #tpu.memory_space<vmem>>, vector<8x128xf32>
      tpu.vector_store %arg8[%c0_16, %c0_17], %21 {strides = array<i32>} : memref<8x128xf32, #tpu.memory_space<vmem>>, vector<8x128xf32>,
    } else {
    }
    %c0 = arith.constant 0 : index
    %c0_1 = arith.constant 0 : index
    %3 = vector.load %arg2[%c0, %c0_1] : memref<8x1568xf32, #tpu.memory_space<vmem>>, vector<8x1568xf32>
    %4 = arith.truncf %3 : vector<8x1568xf32> to vector<8x1568xbf16>
    %c0_2 = arith.constant 0 : index
    %c0_3 = arith.constant 0 : index
    %5 = vector.load %arg3[%c0_2, %c0_3] : memref<1568x256xbf16, #tpu.memory_space<vmem>>, vector<1568x256xbf16>
    %cst = arith.constant dense<0.000000e+00> : vector<8x256xf32>
    %6 = tpu.matmul %4, %5, %cst {dimension_numbers = #tpu.dot_dimension_numbers<[1], [0], [0], [1], [0, 0, 1, 1], [], []>} : vector<8x1568xbf16>, vector<1568x256xbf16>, vector<8x256xf32> -> vector<8x256xf32>
    %c0_4 = arith.constant 0 : index
    %c0_5 = arith.constant 0 : index
    %7 = vector.load %arg4[%c0_4, %c0_5] : memref<1x256xf32, #tpu.memory_space<vmem>>, vector<1x256xf32>
    %8 = vector.broadcast %7 : vector<1x256xf32> to vector<8x256xf32>
    %9 = arith.addf %6, %8 : vector<8x256xf32>
    %cst_6 = arith.constant 0.000000e+00 : f32
    %10 = vector.broadcast %cst_6 : f32 to vector<8x256xf32>
    %11 = arith.maximumf %9, %10 : vector<8x256xf32>
    %c0_7 = arith.constant 0 : index
    %c0_8 = arith.constant 0 : index
    %12 = vector.load %arg8[%c0_7, %c0_8] : memref<8x128xf32, #tpu.memory_space<vmem>>, vector<8x128xf32>
    %13 = arith.truncf %11 : vector<8x256xf32> to vector<8x256xbf16>
    %c0_9 = arith.constant 0 : index
    %c0_10 = arith.constant 0 : index
    %14 = vector.load %arg5[%c0_9, %c0_10] : memref<256x128xbf16, #tpu.memory_space<vmem>>, vector<256x128xbf16>
    %cst_11 = arith.constant dense<0.000000e+00> : vector<8x128xf32>
    %15 = tpu.matmul %13, %14, %cst_11 {dimension_numbers = #tpu.dot_dimension_numbers<[1], [0], [0], [1], [0, 0, 1, 1], [], []>} : vector<8x256xbf16>, vector<256x128xbf16>, vector<8x128xf32> -> vector<8x128xf32>
    %16 = arith.addf %12, %15 : vector<8x128xf32>
    %c0_12 = arith.constant 0 : index
    %c0_13 = arith.constant 0 : index
    %17 = vector.load %arg8[%c0_12, %c0_13] : memref<8x128xf32, #tpu.memory_space<vmem>>, vector<8x128xf32>
    tpu.vector_store %arg8[%c0_12, %c0_13], %16 {strides = array<i32>} : memref<8x128xf32, #tpu.memory_space<vmem>>, vector<8x128xf32>,
    %c3_i32 = arith.constant 3 : i32
    %18 = arith.cmpi eq, %arg1, %c3_i32 : i32
    %19 = arith.extui %18 : i1 to i32
    %c0_i32_14 = arith.constant 0 : i32
    %20 = arith.cmpi ne, %19, %c0_i32_14 : i32
    scf.if %20 {
      %c0_15 = arith.constant 0 : index
      %c0_16 = arith.constant 0 : index
      %21 = vector.load %arg8[%c0_15, %c0_16] : memref<8x128xf32, #tpu.memory_space<vmem>>, vector<8x128xf32>
      %c0_17 = arith.constant 0 : index
      %c0_18 = arith.constant 0 : index
      %22 = vector.load %arg6[%c0_17, %c0_18] : memref<1x128xf32, #tpu.memory_space<vmem>>, vector<1x128xf32>
      %23 = vector.broadcast %22 : vector<1x128xf32> to vector<8x128xf32>
      %24 = arith.addf %21, %23 : vector<8x128xf32>
      %c0_19 = arith.constant 0 : index
      %c0_20 = arith.constant 0 : index
      %25 = vector.load %arg7[%c0_19, %c0_20] : memref<8x128xf32, #tpu.memory_space<vmem>>, vector<8x128xf32>
      tpu.vector_store %arg7[%c0_19, %c0_20], %24 {strides = array<i32>} : memref<8x128xf32, #tpu.memory_space<vmem>>, vector<8x128xf32>,
    } else {
    }
    return
  }
  func.func @transform_0(%arg0: i32, %arg1: i32) -> (i32, i32) {
    %c0_i32 = arith.constant 0 : i32
    %c0_i32_0 = arith.constant 0 : i32
    return %arg0, %c0_i32 : i32, i32
  }
  func.func @transform_1(%arg0: i32, %arg1: i32) -> (i32, i32) {
    %c0_i32 = arith.constant 0 : i32
    %c0_i32_0 = arith.constant 0 : i32
    return %c0_i32, %arg1 : i32, i32
  }
  func.func @transform_2(%arg0: i32, %arg1: i32) -> (i32, i32) {
    %c0_i32 = arith.constant 0 : i32
    %c0_i32_0 = arith.constant 0 : i32
    return %c0_i32, %arg1 : i32, i32
  }
  func.func @transform_3(%arg0: i32, %arg1: i32) -> (i32, i32) {
    %c0_i32 = arith.constant 0 : i32
    %c0_i32_0 = arith.constant 0 : i32
    return %arg1, %c0_i32 : i32, i32
  }
  func.func @transform_4(%arg0: i32, %arg1: i32) -> (i32, i32) {
    %c0_i32 = arith.constant 0 : i32
    %c0_i32_0 = arith.constant 0 : i32
    %c0_i32_1 = arith.constant 0 : i32
    return %c0_i32, %c0_i32_0 : i32, i32
  }
  func.func @transform_5(%arg0: i32, %arg1: i32) -> (i32, i32) {
    %c0_i32 = arith.constant 0 : i32
    %c0_i32_0 = arith.constant 0 : i32
    return %arg0, %c0_i32 : i32, i32
  }
}

</mosaic_0001>

<bundles_post_ra>
// kernel: discriminator_forward.1
= control target key start
LH: loop header
LB: loop body
LE: loop exit
PB: predicated region body
PF: predicated region fallthrough
CT: control target
= control target key end

     0   :  { %s3604_s0 = inlined_call_operand.vmem [shape: f32[8,1568], index: 0, kind: input, shape index: {}]   ;;  %s3605_s1 = inlined_call_operand.hbm [shape: bf16[1568,1024], index: 1, kind: input, shape index: {}]   ;;  %s3606_s2 = inlined_call_operand.hbm [shape: f32[1,1024], index: 2, kind: input, shape index: {}]   ;;  %s3607_s3 = inlined_call_operand.hbm [shape: bf16[1024,128], index: 3, kind: input, shape index: {}]   ;;  %s3608_s4 = inlined_call_operand.hbm [shape: f32[1,128], index: 4, kind: input, shape index: {}]   ;;  %s3609_s5 = inlined_call_operand.vmem [shape: f32[8,128], index: 5, kind: output, shape index: {}]  }
   0x1   :  { %3620 = sst [smem:[#allocation15_spill]] %s3606_s2 }
   0x2   :  { %10 = vsyncpa [#allocation4], 0 }
   0x3   :  { %12 = vsyncpa [#allocation4 + $0x1], 0 }
   0x4   :  { %13 = vsyncpa [#allocation6], 0 }
   0x5   :  { %15 = vsyncpa [#allocation6 + $0x1], 0 }
   0x6   :  { %16 = vsyncpa [#allocation9], 0  ;;  %s3103_s18 = smov 0   ;;  %s3105_s19 = smov 0  }
   0x7   :  { %s3107_s20 = smov 0   ;;  %s3109_s21 = smov 0  }
   0x8   :  { %s3111_s22 = smov 0   ;;  %s3113_s23 = smov 0  }
   0x9 LB: > { %s31_s24 = sadd.s32 1, %s3056_s22  ;;  %s67_s25 = sadd.s32 1, %s3048_s20  ;;  %s3060_s23 = sphi %s3113_s23, %s22_s23   ;;  %s3056_s22 = sphi %s3111_s22, %s3643_s22   ;;  %s3052_s21 = sphi %s3109_s21, %s3642_s21   ;;  %s3048_s20 = sphi %s3107_s20, %s3641_s20   ;;  %s3044_s19 = sphi %s3105_s19, %s3640_s19   ;;  %s3040_s18 = sphi %s3103_s18, %s3639_s18  }
   0xa   : > { %p32_p0 = scmp.ge.s32.totalorder %s31_s24, 4  ;;  %p74_p1 = scmp.ne.s32.totalorder %s3048_s20, %s3044_s19 }
   0xb   : > { %p75_p2 = scmp.eq.s32.totalorder %s3060_s23, 0  ;;  %p2516_p4 = scmp.lt.s32.totalorder %s3060_s23, 4 }
   0xc   : > { %s3645_s24 = smov (%p32_p0, %s31_s24), 0  ;;  %s3144_s27 = sand.u32 1, %s3048_s20  }
   0xd   : > { %3621 = sst [smem:[#allocation13_spill]] %s3645_s24  ;;  %p76_p3 = por %p75_p2, %p74_p1 }
   0xe   : > { %s64_s26 = ssub.s32 %s3056_s22, %s3645_s24  ;;  %s2489_s28 = smul.u32 1568, %s3144_s27 }
   0xf   : > { %p65_p5 = scmp.eq.s32.totalorder %s64_s26, 0  ;;  %p3147_p6 = pnand %p2516_p4, %p76_p3 }
  0x10   : > { %s243_s30 = sand.u32 1, %s3060_s23   ;;  %s2211_s7 = sshll.u32 %s3144_s27, 1 }
  0x11   : > { %s3622_s29 = scalar_select %p3147_p6, 1, 0 }
  0x12   : > { %s3153_s6 = scalar_select %p65_p5, %s3048_s20, %s67_s25  }
  0x13   : > { %s2441_s8 = sshll.u32 %s3056_s22, 5  ;;  %s3624_s2 = sld [smem:[#allocation15_spill]] }
  0x14   : > { %3623 = sst [smem:[#allocation14_spill]] %s3153_s6  ;;  %s247_s12 = scalar_lea.vmem [#allocation5], %s2211_s7 }
  0x15   : > { %s255_s13 = sshll.u32 %s247_s12, 4  ;;  %s3165_s15 = scalar_lea.sflag [#allocation6], %s243_s30  ;;  %s3163_s13 = int_to_ptr.vmem [resolvable:$true] %s255_s13 }
  0x16   : > { %p3171_p8 = pneg %p3147_p6 }
  0x18   : > { %s3625_s17 = scalar_select %p3171_p8, 1, 0 }
  0x19   : > { %s3160_s11 = scalar_lea.hbm %s3624_s2, %s2441_s8  ;;  %s2889_s7 = scalar_lea.hbm %s3624_s2, 128 }
  0x1a   : > { %s2884_s16 = scalar_lea.hbm %s3160_s11, 32  ;;  %p2890_p11 = scmp.lt.u32.totalorder %s3160_s11, %s3624_s2 }
  0x1b   : > { %p2885_p7 = scmp.ne.s32.totalorder %s3160_s11, %s2884_s16  ;;  %p2891_p12 = scmp.lt.u32.totalorder %s2889_s7, %s2884_s16 }
  0x1c   : > { %p2893_p0 = scmp.lt.u32.totalorder %s2884_s16, %s3160_s11 }
  0x1d   : > { %p2887_p9 = pnand %p3171_p8, %p2885_p7  ;;  %p2892_p13 = por %p2891_p12, %p2890_p11 }
  0x1f   : > { %p2888_p10 = pneg %p2887_p9  ;;  %p2894_p1 = por %p2893_p0, %p2892_p13 }
  0x21   : > { %p2895_p2 = pnand %p2894_p1, %p2888_p10 }
  0x23   : > { %2898 = shalt.err (!%p2895_p2)
}
  0x24   : > { %s2899_s30 = scalar_lea.vmem %s3163_s13, 32  ;;  %s3062_s10 = smov [#allocation5]  }
  0x25   : > { %p2900_p3 = scmp.ne.s32.totalorder %s3163_s13, %s2899_s30  ;;  %s2904_s12 = sshll.u32 %s3062_s10, 4  ;;  %s2905_s12 = int_to_ptr.vmem [resolvable:$false] %s2904_s12 }
  0x26   : > { %s2906_s25 = scalar_lea.vmem %s2905_s12, 64  ;;  %p2907_p7 = scmp.lt.s32.totalorder %s3163_s13, %s2905_s12 }
  0x27   : > { %p2902_p4 = pnand %p2900_p3, %p3171_p8  ;;  %p2908_p9 = scmp.lt.s32.totalorder %s2906_s25, %s2899_s30 }
  0x29   : > { %p2903_p5 = pneg %p2902_p4  ;;  %p2909_p11 = por %p2908_p9, %p2907_p7 }
  0x2b   : > { %p2910_p12 = pnand %p2909_p11, %p2903_p5 }
  0x2d   : > { %2913 = shalt.err (!%p2910_p12)
}
  0x2e   : > { %2511 = dma.hbm_to_vmem [thread:$0]  (!%p3147_p6), %s3160_s11, 32, %s3163_s13, %s3165_s15  }
  0x2f   : > { %s3610_s16 = sadd.s32 4294967295, %s3060_s23   ;;  %p80_p10 = scmp.ne.s32.totalorder %s3044_s19, %s3040_s18 }
  0x30   : > { %p3200_p13 = scmp.eq.s32.totalorder %s3610_s16, 0  ;;  %p2205_p0 = scmp.ge.s32.totalorder %s3060_s23, 1 }
  0x31   : > { %p190_p1 = scmp.lt.s32.totalorder %s3060_s23, 5  ;;  %s3063_s18 = smov [#allocation8]  }
  0x32   : > { %s3626_s26 = scalar_select %p3200_p13, 1, 0 }
  0x33   : > { %p3208_p2 = por %p3200_p13, %p80_p10  ;;  %p3212_p3 = pnand %p2205_p0, %p190_p1 }
  0x34   : > { %s211_s11 = sshll.u32 %s3063_s18, 4  ;;  %s2440_s13 = sshll.u32 %s3056_s22, 7  ;;  %s212_s11 = int_to_ptr.vmem [resolvable:$true] %s211_s11 }
  0x35   : > { %s3627_s7 = scalar_select %p3208_p2, 1, 0 }
  0x36   : > { %s3628_s8 = scalar_select %p3212_p3, 1, 0 }
  0x37   : > { %p2501_p4 = pneg %p3212_p3  ;;  %s3228_s12 = scalar_lea.hbm %s3605_s1, %s2440_s13 }
  0x38   : > { %s226_s25 = scalar_lea.vmem [#allocation3], %s2489_s28  ;;  %s2914_s2 = scalar_lea.hbm %s3608_s4, 16 }
  0x39   : > { %p3221_p5 = pnand %p2501_p4, %p3200_p13  ;;  %s233_s16 = sshll.u32 %s226_s25, 4  ;;  %s3232_s16 = int_to_ptr.vmem [resolvable:$true] %s233_s16 }
  0x3a   : > { %p2915_p7 = scmp.ne.s32.totalorder %s3608_s4, %s2914_s2  ;;  %p2921_p10 = scmp.lt.u32.totalorder %s2914_s2, %s3608_s4 }
  0x3b   : > { %p2916_p9 = pneg %p3221_p5 }
  0x3d   : > { %p2917_p11 = pnand %p2916_p9, %p2915_p7 }
  0x3f   : > { %p2918_p12 = pneg %p2917_p11 }
  0x41   : > { %p2923_p0 = pnand %p2921_p10, %p2918_p12 }
  0x43   : > { %2926 = shalt.err (!%p2923_p0)
}
  0x44   : > { %s2927_s28 = scalar_lea.vmem %s212_s11, 16  ;;  %s2934_s14 = scalar_lea.vmem %s212_s11, 32 }
  0x45   : > { %p2928_p1 = scmp.ne.s32.totalorder %s212_s11, %s2927_s28  ;;  %p2935_p2 = scmp.lt.s32.totalorder %s212_s11, %s212_s11 }
  0x46   : > { %p2936_p3 = scmp.lt.s32.totalorder %s2934_s14, %s2927_s28 }
  0x47   : > { %p2930_p4 = pnand %p2928_p1, %p2916_p9 }
  0x48   : > { %p2937_p6 = por %p2936_p3, %p2935_p2 }
  0x49   : > { %p2931_p13 = pneg %p2930_p4 }
  0x4b   : > { %p2938_p8 = pnand %p2937_p6, %p2931_p13 }
  0x4d   : > { %2941 = shalt.err (!%p2938_p8)
}
  0x4e   : > { %2504 = dma.hbm_to_vmem [thread:$0]  (!%p3221_p5), %s3608_s4, 16, %s212_s11, [#allocation9]  }
  0x4f   : > { %s223_s2 = scalar_lea.sflag [#allocation4], %s3144_s27  ;;  %s2942_s10 = scalar_lea.hbm %s3228_s12, 25088 }
  0x50   : > { %p2943_p7 = scmp.ne.s32.totalorder %s3228_s12, %s2942_s10  ;;  %p3630_p9 = scmp.ne.s32.totalorder %s3625_s17, 0 }
  0x51   : > { %s2947_s9 = scalar_lea.hbm %s3605_s1, 100352  ;;  %p2948_p6 = scmp.lt.u32.totalorder %s3228_s12, %s3605_s1 }
  0x52   : > { %p2945_p11 = pnand %p2943_p7, %p3630_p9  ;;  %p2949_p8 = scmp.lt.u32.totalorder %s2947_s9, %s2942_s10 }
  0x53   : > { %p2951_p3 = scmp.lt.u32.totalorder %s2942_s10, %s3228_s12 }
  0x54   : > { %p2946_p2 = pneg %p2945_p11  ;;  %p2950_p13 = por %p2949_p8, %p2948_p6 }
  0x56   : > { %p2952_p12 = por %p2951_p3, %p2950_p13 }
  0x58   : > { %p2953_p10 = pnand %p2952_p12, %p2946_p2 }
  0x5a   : > { %2956 = shalt.err (!%p2953_p10)
}
  0x5b   : > { %s2957_s11 = scalar_lea.vmem %s3232_s16, 25088  ;;  %s3064_s28 = smov [#allocation3]  }
  0x5c   : > { %p2958_p5 = scmp.ne.s32.totalorder %s3232_s16, %s2957_s11  ;;  %s2962_s14 = sshll.u32 %s3064_s28, 4  ;;  %s2963_s14 = int_to_ptr.vmem [resolvable:$false] %s2962_s14 }
  0x5d   : > { %s2964_s24 = scalar_lea.vmem %s2963_s14, 50176  ;;  %p2965_p4 = scmp.lt.s32.totalorder %s3232_s16, %s2963_s14 }
  0x5e   : > { %p2960_p0 = pnand %p2958_p5, %p3630_p9  ;;  %p2966_p7 = scmp.lt.s32.totalorder %s2964_s24, %s2957_s11 }
  0x60   : > { %p2961_p1 = pneg %p2960_p0  ;;  %p2967_p11 = por %p2966_p7, %p2965_p4 }
  0x62   : > { %p2968_p6 = pnand %p2967_p11, %p2961_p1 }
  0x64   : > { %2971 = shalt.err (!%p2968_p6)
}
  0x65   : > { %s3065_s6 = smov 512   ;;  %s3066_s10 = smov 128  }
  0x66   : > { %s3067_s25 = smov 8   ;;  %p3631_p2 = scmp.ne.s32.totalorder %s3622_s29, 0 }
  0x67   : > { %s2442_s18 = sshll.u32 %s3056_s22, 11  ;;  %s3632_s11 = sshll.u32 %s3144_s27, 7 }
  0x68   : > { %2508 = dma.hbm_to_vmem [thread:$0]  (!%p3631_p2), %s3228_s12, 25088, %s3232_s16, %s223_s2, %s3065_s6, %s3066_s10, %s3067_s25  }
  0x69   : > { %s3278_s13 = scalar_lea.hbm %s3607_s3, %s2442_s18  ;;  %s266_s28 = scalar_lea.vmem [#allocation7], %s3632_s11 }
  0x6a   : > { %s273_s14 = sshll.u32 %s266_s28, 4  ;;  %s2972_s24 = scalar_lea.hbm %s3278_s13, 2048  ;;  %s3282_s14 = int_to_ptr.vmem [resolvable:$true] %s273_s14 }
  0x6b   : > { %p2973_p8 = scmp.ne.s32.totalorder %s3278_s13, %s2972_s24  ;;  %s2977_s2 = scalar_lea.hbm %s3607_s3, 8192 }
  0x6c   : > { %p2978_p12 = scmp.lt.u32.totalorder %s3278_s13, %s3607_s3  ;;  %p2979_p10 = scmp.lt.u32.totalorder %s2977_s2, %s2972_s24 }
  0x6d   : > { %p2975_p13 = pnand %p2973_p8, %p3630_p9  ;;  %p2981_p0 = scmp.lt.u32.totalorder %s2972_s24, %s3278_s13 }
  0x6e   : > { %p2980_p5 = por %p2979_p10, %p2978_p12 }
  0x6f   : > { %p2976_p3 = pneg %p2975_p13 }
  0x70   : > { %p2982_p1 = por %p2981_p0, %p2980_p5 }
  0x72   : > { %p2983_p4 = pnand %p2982_p1, %p2976_p3 }
  0x74   : > { %2986 = shalt.err (!%p2983_p4)
}
  0x75   : > { %s2987_s27 = scalar_lea.vmem %s3282_s14, 2048  ;;  %s3068_s25 = smov [#allocation7]  }
  0x76   : > { %p2988_p7 = scmp.ne.s32.totalorder %s3282_s14, %s2987_s27  ;;  %s2992_s18 = sshll.u32 %s3068_s25, 4  ;;  %s2993_s18 = int_to_ptr.vmem [resolvable:$false] %s2992_s18 }
  0x77   : > { %s2994_s9 = scalar_lea.vmem %s2993_s18, 4096  ;;  %p2995_p8 = scmp.lt.s32.totalorder %s3282_s14, %s2993_s18 }
  0x78   : > { %p2990_p11 = pnand %p2988_p7, %p3630_p9  ;;  %p2996_p13 = scmp.lt.s32.totalorder %s2994_s9, %s2987_s27 }
  0x7a   : > { %p2991_p6 = pneg %p2990_p11  ;;  %p2997_p12 = por %p2996_p13, %p2995_p8 }
  0x7c   : > { %p2998_p10 = pnand %p2997_p12, %p2991_p6 }
  0x7e   : > { %3001 = shalt.err (!%p2998_p10)
}
  0x7f   : > { %s3069_s30 = smov 64   ;;  %s3070_s11 = smov 4  }
  0x80   : > { %2514 = dma.hbm_to_vmem [thread:$0]  (!%p3631_p2), %s3278_s13, 2048, %s3282_s14, %s3165_s15, %s3069_s30, %s3069_s30, %s3070_s11  }
  0x81   : > { %p3633_p9 = scmp.ne.s32.totalorder %s3628_s8, 0 }
  0x82   : > { %s287_s17 = sand.u32 (!%p3633_p9), 1, %s3044_s19   ;;  %p3634_p3 = scmp.ne.s32.totalorder (!%p3633_p9), %s3627_s7, 0 }
  0x83   : > { %285 = sbr.rel (%p3633_p9) target bundleno = 809 (0x329), region = 40  ;;  %s288_s24 = scalar_lea.sflag (!%p3633_p9), [#allocation4], %s287_s17 }
  0x84   : > { %s2490_s28 = smul.u32 (!%p3633_p9), 1568, %s287_s17 }
  0x86   : > { %s3309_s16 = scalar_lea.vmem (!%p3633_p9), [#allocation3], %s2490_s28 }
  0x8a   : > { %3027 = dma.done.wait (%p3634_p3), %s288_s24, 25088  }
  0x8b   : > { %3029 = vsyncadd (%p3634_p3), %s288_s24, 4294942208  ;;  %s3635_s12 = sadd.s32 4294967295, %s3060_s23   ;;  %s2218_s15 = sshll.u32 %s287_s17, 1 }
  0x8c   : > { %s296_s29 = sand.u32 1, %s3635_s12   ;;  %s3317_s8 = scalar_lea.vmem [#allocation5], %s2218_s15 }
  0x8d   : > { %s297_s13 = scalar_lea.sflag [#allocation6], %s296_s29 }
  0x8e   : > { %3031 = dma.done.wait (%p3634_p3), %s297_s13, 2080  }
  0x8f   : > { %3033 = vsyncadd (%p3634_p3), %s297_s13, 4294965216  ;;  %s2219_s14 = sshll.u32 %s287_s17, 7  ;;  %p3636_p2 = scmp.ne.s32.totalorder %s3626_s26, 0 }
  0x90   : > { %s3323_s2 = scalar_lea.vmem [#allocation7], %s2219_s14 }
  0x91   : > { %3035 = dma.done.wait (%p3636_p2), [#allocation9], 16  }
  0x92   : > { %3037 = vsyncadd (%p3636_p2), [#allocation9], 4294967280  ;;  %p2221_p5 = scmp.ne.s32.totalorder %s3052_s21, 0 }
  0x93   : > { %v3071_v0 = vmov (!%p2221_p5), 0.0  }
  0x94   : > { %370 = sbr.rel (%p2221_p5) target bundleno = 155 (0x9b), region = 60  ;;  %371 = vst [vmem:[#allocation2] sm:$0xff] (!%p2221_p5), %v3071_v0 }
  0x9b PF: > { %v2574_v1 = vld [vmem:[%s3309_s16 + $0x4] ss:$8 sps:$4 sm:$0xff]   ;;  %v2578_v3 = vld [vmem:[%s3309_s16] ss:$8 sps:$4 sm:$0xff]   ;;  %v2580_v5 = vld [vmem:[%s3309_s16 + $0x14] ss:$8 sps:$4 sm:$0xff]  }
  0x9c   : > { %v2576_v2 = vld [vmem:[%s3309_s16 + $0x304] ss:$8 sps:$4 sm:$0xff]   ;;  %1590 = vmatprep.subr.bf16.mxu1 %v2574_v1  ;;  %v2579_v4 = vld [vmem:[%s3309_s16 + $0x300] ss:$8 sps:$4 sm:$0xff]   ;;  %v2582_v6 = vld [vmem:[%s3309_s16 + $0x314] ss:$8 sps:$4 sm:$0xff]  }
  0x9d   : > { %1713 = vmatprep.subr.bf16.mxu0 %v2576_v2  ;;  %1591 = vmatpush1.bf16.msra.mxu1 %v2578_v3  ;;  %v2584_v7 = vld [vmem:[%s3309_s16 + $0x10] ss:$8 sps:$4 sm:$0xff]   ;;  %v2586_v9 = vld [vmem:[%s3309_s16 + $0x24] ss:$8 sps:$4 sm:$0xff]   ;;  %v2590_v11 = vld [vmem:[%s3309_s16 + $0x20] ss:$8 sps:$4 sm:$0xff]  }
  0x9e   : > { %1714 = vmatpush1.bf16.msra.mxu0 %v2579_v4  ;;  %1592 = vmatprep.subr.bf16.mxu1 %v2580_v5  ;;  %v2585_v8 = vld [vmem:[%s3309_s16 + $0x310] ss:$8 sps:$4 sm:$0xff]   ;;  %v2588_v10 = vld [vmem:[%s3309_s16 + $0x324] ss:$8 sps:$4 sm:$0xff]   ;;  %v2591_v12 = vld [vmem:[%s3309_s16 + $0x320] ss:$8 sps:$4 sm:$0xff]  }
  0x9f   : > { %1715 = vmatprep.subr.bf16.mxu0 %v2582_v6  ;;  %v2592_v13 = vld [vmem:[%s3309_s16 + $0x34] ss:$8 sps:$4 sm:$0xff]   ;;  %v2596_v15 = vld [vmem:[%s3309_s16 + $0x30] ss:$8 sps:$4 sm:$0xff]   ;;  %v2598_v17 = vld [vmem:[%s3309_s16 + $0x44] ss:$8 sps:$4 sm:$0xff]  }
  0xa0   : > { %v2594_v14 = vld [vmem:[%s3309_s16 + $0x334] ss:$8 sps:$4 sm:$0xff]   ;;  %v2597_v16 = vld [vmem:[%s3309_s16 + $0x330] ss:$8 sps:$4 sm:$0xff]   ;;  %v2600_v18 = vld [vmem:[%s3309_s16 + $0x344] ss:$8 sps:$4 sm:$0xff]  }
  0xa1   : > { %1593 = vmatpush1.bf16.msra.mxu1 %v2584_v7  ;;  %v2602_v19 = vld [vmem:[%s3309_s16 + $0x40] ss:$8 sps:$4 sm:$0xff]   ;;  %v2604_v21 = vld [vmem:[%s3309_s16 + $0x54] ss:$8 sps:$4 sm:$0xff]   ;;  %v2608_v23 = vld [vmem:[%s3309_s16 + $0x50] ss:$8 sps:$4 sm:$0xff]  }
  0xa2   : > { %1716 = vmatpush1.bf16.msra.mxu0 %v2585_v8  ;;  %1594 = vmatprep.subr.bf16.mxu1 %v2586_v9  ;;  %v2603_v20 = vld [vmem:[%s3309_s16 + $0x340] ss:$8 sps:$4 sm:$0xff]   ;;  %v2606_v22 = vld [vmem:[%s3309_s16 + $0x354] ss:$8 sps:$4 sm:$0xff]   ;;  %v2609_v24 = vld [vmem:[%s3309_s16 + $0x350] ss:$8 sps:$4 sm:$0xff]  }
  0xa3   : > { %1717 = vmatprep.subr.bf16.mxu0 %v2588_v10  ;;  %v2610_v25 = vld [vmem:[%s3309_s16 + $0x64] ss:$8 sps:$4 sm:$0xff]   ;;  %v2614_v27 = vld [vmem:[%s3309_s16 + $0x60] ss:$8 sps:$4 sm:$0xff]   ;;  %v2616_v29 = vld [vmem:[%s3309_s16 + $0x74] ss:$8 sps:$4 sm:$0xff]  }
  0xa4   : > { %v2612_v26 = vld [vmem:[%s3309_s16 + $0x364] ss:$8 sps:$4 sm:$0xff]   ;;  %v2615_v28 = vld [vmem:[%s3309_s16 + $0x360] ss:$8 sps:$4 sm:$0xff]   ;;  %v2618_v30 = vld [vmem:[%s3309_s16 + $0x374] ss:$8 sps:$4 sm:$0xff]  }
  0xa5   : > { %1595 = vmatpush1.bf16.msra.mxu1 %v2590_v11  ;;  %v2620_v31 = vld [vmem:[%s3309_s16 + $0x70] ss:$8 sps:$4 sm:$0xff]   ;;  %v2622_v33 = vld [vmem:[%s3309_s16 + $0x84] ss:$8 sps:$4 sm:$0xff]   ;;  %v2626_v35 = vld [vmem:[%s3309_s16 + $0x80] ss:$8 sps:$4 sm:$0xff]  }
  0xa6   : > { %1718 = vmatpush1.bf16.msra.mxu0 %v2591_v12  ;;  %1596 = vmatprep.subr.bf16.mxu1 %v2592_v13  ;;  %v2621_v32 = vld [vmem:[%s3309_s16 + $0x370] ss:$8 sps:$4 sm:$0xff]   ;;  %v2624_v34 = vld [vmem:[%s3309_s16 + $0x384] ss:$8 sps:$4 sm:$0xff]   ;;  %v2627_v36 = vld [vmem:[%s3309_s16 + $0x380] ss:$8 sps:$4 sm:$0xff]  }
  0xa7   : > { %1719 = vmatprep.subr.bf16.mxu0 %v2594_v14  ;;  %v2628_v37 = vld [vmem:[%s3309_s16 + $0x94] ss:$8 sps:$4 sm:$0xff]   ;;  %v2632_v39 = vld [vmem:[%s3309_s16 + $0x90] ss:$8 sps:$4 sm:$0xff]   ;;  %v2634_v41 = vld [vmem:[%s3309_s16 + $0xa4] ss:$8 sps:$4 sm:$0xff]  }
  0xa8   : > { %v2630_v38 = vld [vmem:[%s3309_s16 + $0x394] ss:$8 sps:$4 sm:$0xff]   ;;  %v2633_v40 = vld [vmem:[%s3309_s16 + $0x390] ss:$8 sps:$4 sm:$0xff]   ;;  %v2636_v42 = vld [vmem:[%s3309_s16 + $0x3a4] ss:$8 sps:$4 sm:$0xff]  }
  0xa9   : > { %1597 = vmatpush1.bf16.msra.mxu1 %v2596_v15  ;;  %v2638_v43 = vld [vmem:[%s3309_s16 + $0xa0] ss:$8 sps:$4 sm:$0xff]   ;;  %v2640_v45 = vld [vmem:[%s3309_s16 + $0xb4] ss:$8 sps:$4 sm:$0xff]   ;;  %v2644_v48 = vld [vmem:[%s3309_s16 + $0xb0] ss:$8 sps:$4 sm:$0xff]  }
  0xaa   : > { %1720 = vmatpush1.bf16.msra.mxu0 %v2597_v16  ;;  %1598 = vmatprep.subr.bf16.mxu1 %v2598_v17  ;;  %v2639_v44 = vld [vmem:[%s3309_s16 + $0x3a0] ss:$8 sps:$4 sm:$0xff]   ;;  %v2642_v46 = vld [vmem:[%s3309_s16 + $0x3b4] ss:$8 sps:$4 sm:$0xff]   ;;  %v2645_v50 = vld [vmem:[%s3309_s16 + $0x3b0] ss:$8 sps:$4 sm:$0xff]  }
  0xab   : > { %1721 = vmatprep.subr.bf16.mxu0 %v2600_v18  ;;  %v373_v47 = vld [vmem:[%s3604_s0 + $0x8] sm:$0xff]  ;;  %v379_v51 = vld [vmem:[%s3604_s0 + $0x38] sm:$0xff]  ;;  %v372_v6 = vld [vmem:[%s3604_s0] sm:$0xff]  ;;  %vm1586_vm0 = vcmask 261120   ;;  %p2435_p0 = scmp.ne.s32.totalorder %s3052_s21, 3 }
  0xac   : > { %v386_v49 = vpack.c.bf16 %v373_v47, %v373_v47  ;;  %v2646_v52 = vld [vmem:[%s3309_s16 + $0xc4] ss:$8 sps:$4 sm:$0xff]   ;;  %v392_v54 = vpack.c.bf16 %v379_v51, %v379_v51  ;;  %v2650_v55 = vld [vmem:[%s3309_s16 + $0xc0] ss:$8 sps:$4 sm:$0xff]   ;;  %v2652_v57 = vld [vmem:[%s3309_s16 + $0xd4] ss:$8 sps:$4 sm:$0xff]   ;;  %v385_v11 = vpack.c.bf16 %v372_v6, %v372_v6 }
  0xad   : > { %1599 = vmatpush1.bf16.msra.mxu1 %v2602_v19  ;;  %v2648_v53 = vld [vmem:[%s3309_s16 + $0x3c4] ss:$8 sps:$4 sm:$0xff]   ;;  %v2651_v56 = vld [vmem:[%s3309_s16 + $0x3c0] ss:$8 sps:$4 sm:$0xff]   ;;  %v2654_v58 = vld [vmem:[%s3309_s16 + $0x3d4] ss:$8 sps:$4 sm:$0xff]  }
  0xae   : > { %1722 = vmatpush1.bf16.msra.mxu0 %v2603_v20  ;;  %1600 = vmatprep.subr.bf16.mxu1 %v2604_v21  ;;  %v2656_v59 = vld [vmem:[%s3309_s16 + $0xd0] ss:$8 sps:$4 sm:$0xff]   ;;  %v2658_v61 = vld [vmem:[%s3309_s16 + $0xe4] ss:$8 sps:$4 sm:$0xff]   ;;  %v2662_v63 = vld [vmem:[%s3309_s16 + $0xe0] ss:$8 sps:$4 sm:$0xff]  }
  0xaf   : > { %1723 = vmatprep.subr.bf16.mxu0 %v2606_v22  ;;  %1622 = vmatprep.mubr.bf16.mxu1 %v386_v49  ;;  %v2657_v60 = vld [vmem:[%s3309_s16 + $0x3d0] ss:$8 sps:$4 sm:$0xff]   ;;  %v2660_v62 = vld [vmem:[%s3309_s16 + $0x3e4] ss:$8 sps:$4 sm:$0xff]   ;;  %v2663_v0 = vld [vmem:[%s3309_s16 + $0x3e0] ss:$8 sps:$4 sm:$0xff]  }
  0xb0   : > { %1745 = vmatprep.mubr.bf16.mxu0 %v392_v54  ;;  %v2664_v1 = vld [vmem:[%s3309_s16 + $0xf4] ss:$8 sps:$4 sm:$0xff]   ;;  %v2668_v3 = vld [vmem:[%s3309_s16 + $0xf0] ss:$8 sps:$4 sm:$0xff]   ;;  %v2672_v5 = vld [vmem:[%s3309_s16 + $0x104] ss:$8 sps:$4 sm:$0xff]  }
  0xb1   : > { %1601 = vmatpush1.bf16.msra.mxu1 %v2608_v23  ;;  %v2666_v2 = vld [vmem:[%s3309_s16 + $0x3f4] ss:$8 sps:$4 sm:$0xff]   ;;  %v2669_v4 = vld [vmem:[%s3309_s16 + $0x3f0] ss:$8 sps:$4 sm:$0xff]   ;;  %v378_v7 = vld [vmem:[%s3604_s0 + $0x30] sm:$0xff] }
  0xb2   : > { %1724 = vmatpush1.bf16.msra.mxu0 %v2609_v24  ;;  %1602 = vmatprep.subr.bf16.mxu1 %v2610_v25  ;;  %v2675_v8 = vld [vmem:[%s3309_s16 + $0x404] ss:$8 sps:$4 sm:$0xff]   ;;  %v2670_v9 = vld [vmem:[%s3309_s16 + $0x100] ss:$8 sps:$4 sm:$0xff]   ;;  %v391_v12 = vpack.c.bf16 %v378_v7, %v378_v7  ;;  %v2678_v13 = vld [vmem:[%s3309_s16 + $0x114] ss:$8 sps:$4 sm:$0xff]  }
  0xb3   : > { %1725 = vmatprep.subr.bf16.mxu0 %v2612_v26  ;;  %v2673_v10 = vld [vmem:[%s3309_s16 + $0x400] ss:$8 sps:$4 sm:$0xff]   ;;  %v2681_v14 = vld [vmem:[%s3309_s16 + $0x414] ss:$8 sps:$4 sm:$0xff]   ;;  %v2676_v15 = vld [vmem:[%s3309_s16 + $0x110] ss:$8 sps:$4 sm:$0xff]  }
  0xb4   : > { %v2679_v16 = vld [vmem:[%s3309_s16 + $0x410] ss:$8 sps:$4 sm:$0xff]   ;;  %v2684_v17 = vld [vmem:[%s3309_s16 + $0x124] ss:$8 sps:$4 sm:$0xff]   ;;  %v2682_v19 = vld [vmem:[%s3309_s16 + $0x120] ss:$8 sps:$4 sm:$0xff]  }
  0xb5   : > { %1603 = vmatpush1.bf16.msra.mxu1 %v2614_v27  ;;  %v2687_v18 = vld [vmem:[%s3309_s16 + $0x424] ss:$8 sps:$4 sm:$0xff]   ;;  %v2685_v20 = vld [vmem:[%s3309_s16 + $0x420] ss:$8 sps:$4 sm:$0xff]   ;;  %v2690_v21 = vld [vmem:[%s3309_s16 + $0x134] ss:$8 sps:$4 sm:$0xff]  }
  0xb6   : > { %1726 = vmatpush1.bf16.msra.mxu0 %v2615_v28  ;;  %1604 = vmatprep.subr.bf16.mxu1 %v2616_v29  ;;  %v2693_v22 = vld [vmem:[%s3309_s16 + $0x434] ss:$8 sps:$4 sm:$0xff]   ;;  %v2688_v23 = vld [vmem:[%s3309_s16 + $0x130] ss:$8 sps:$4 sm:$0xff]   ;;  %v2696_v25 = vld [vmem:[%s3309_s16 + $0x144] ss:$8 sps:$4 sm:$0xff]  }
  0xb7   : > { %1727 = vmatprep.subr.bf16.mxu0 %v2618_v30  ;;  %v2691_v24 = vld [vmem:[%s3309_s16 + $0x430] ss:$8 sps:$4 sm:$0xff]   ;;  %v2699_v26 = vld [vmem:[%s3309_s16 + $0x444] ss:$8 sps:$4 sm:$0xff]   ;;  %v2694_v27 = vld [vmem:[%s3309_s16 + $0x140] ss:$8 sps:$4 sm:$0xff]  }
  0xb8   : > { %v2697_v28 = vld [vmem:[%s3309_s16 + $0x440] ss:$8 sps:$4 sm:$0xff]   ;;  %v2702_v29 = vld [vmem:[%s3309_s16 + $0x154] ss:$8 sps:$4 sm:$0xff]   ;;  %v2724_v51 = vld [vmem:[%s3309_s16 + $0x190] ss:$8 sps:$4 sm:$0xff]  }
  0xb9   : > { %1605 = vmatpush1.bf16.msra.mxu1 %v2620_v31  ;;  %v2705_v30 = vld [vmem:[%s3309_s16 + $0x454] ss:$8 sps:$4 sm:$0xff]   ;;  %v2700_v31 = vld [vmem:[%s3309_s16 + $0x150] ss:$8 sps:$4 sm:$0xff]   ;;  %v2718_v47 = vld [vmem:[%s3309_s16 + $0x180] ss:$8 sps:$4 sm:$0xff]  }
  0xba   : > { %1728 = vmatpush1.bf16.msra.mxu0 %v2621_v32  ;;  %1606 = vmatprep.subr.bf16.mxu1 %v2622_v33  ;;  %v2703_v32 = vld [vmem:[%s3309_s16 + $0x450] ss:$8 sps:$4 sm:$0xff]   ;;  %v2708_v33 = vld [vmem:[%s3309_s16 + $0x164] ss:$8 sps:$4 sm:$0xff]   ;;  %v2726_v49 = vld [vmem:[%s3309_s16 + $0x194] ss:$8 sps:$4 sm:$0xff]  }
  0xbb   : > { %1729 = vmatprep.subr.bf16.mxu0 %v2624_v34  ;;  %v2711_v34 = vld [vmem:[%s3309_s16 + $0x464] ss:$8 sps:$4 sm:$0xff]   ;;  %v2754_v7 = vld [vmem:[%s3309_s16 + $0x1e0] ss:$8 sps:$4 sm:$0xff]  }
  0xbc   : > { %v2735_v54 = vld [vmem:[%s3309_s16 + $0x4a4] ss:$8 sps:$4 sm:$0xff]  }
  0xbd   : > { %1607 = vmatpush1.bf16.msra.mxu1 %v2626_v35  ;;  %v375_v35 = vld [vmem:[%s3604_s0 + $0x18] sm:$0xff]  ;;  %v2759_v6 = vld [vmem:[%s3309_s16 + $0x4e4] ss:$8 sps:$4 sm:$0xff]  }
  0xbe   : > { %1730 = vmatpush1.bf16.msra.mxu0 %v2627_v36  ;;  %1608 = vmatprep.subr.bf16.mxu1 %v2628_v37  ;;  %v2706_v36 = vld [vmem:[%s3309_s16 + $0x160] ss:$8 sps:$4 sm:$0xff]   ;;  %v388_v37 = vpack.c.bf16 %v375_v35, %v375_v35  ;;  %v2784_v35 = vld [vmem:[%s3309_s16 + $0x230] ss:$8 sps:$4 sm:$0xff]  }
  0xbf   : > { %1731 = vmatprep.subr.bf16.mxu0 %v2630_v38  ;;  %v2709_v38 = vld [vmem:[%s3309_s16 + $0x460] ss:$8 sps:$4 sm:$0xff]  }
  0xc1   : > { %1609 = vmatpush1.bf16.msra.mxu1 %v2632_v39  ;;  %v381_v39 = vld [vmem:[%s3604_s0 + $0x48] sm:$0xff] }
  0xc2   : > { %1732 = vmatpush1.bf16.msra.mxu0 %v2633_v40  ;;  %1610 = vmatprep.subr.bf16.mxu1 %v2634_v41  ;;  %v2714_v40 = vld [vmem:[%s3309_s16 + $0x174] ss:$8 sps:$4 sm:$0xff]  }
  0xc3   : > { %1733 = vmatprep.subr.bf16.mxu0 %v2636_v42  ;;  %v2717_v41 = vld [vmem:[%s3309_s16 + $0x474] ss:$8 sps:$4 sm:$0xff]   ;;  %v394_v42 = vpack.c.bf16 %v381_v39, %v381_v39  ;;  %v2790_v39 = vld [vmem:[%s3309_s16 + $0x240] ss:$8 sps:$4 sm:$0xff]  }
  0xc5   : > { %1611 = vmatpush1.bf16.msra.mxu1 %v2638_v43  ;;  %v2712_v43 = vld [vmem:[%s3309_s16 + $0x170] ss:$8 sps:$4 sm:$0xff]  }
  0xc6   : > { %1734 = vmatpush1.bf16.msra.mxu0 %v2639_v44  ;;  %1612 = vmatprep.subr.bf16.mxu1 %v2640_v45  ;;  %v2715_v44 = vld [vmem:[%s3309_s16 + $0x470] ss:$8 sps:$4 sm:$0xff]   ;;  %v2720_v45 = vld [vmem:[%s3309_s16 + $0x184] ss:$8 sps:$4 sm:$0xff]  }
  0xc7   : > { %1735 = vmatprep.subr.bf16.mxu0 %v2642_v46  ;;  %v2723_v46 = vld [vmem:[%s3309_s16 + $0x484] ss:$8 sps:$4 sm:$0xff]  }
  0xc9   : > { %1613 = vmatpush1.bf16.msra.mxu1 %v2644_v48  ;;  %v2721_v48 = vld [vmem:[%s3309_s16 + $0x480] ss:$8 sps:$4 sm:$0xff]  }
  0xca   : > { %1736 = vmatpush1.bf16.msra.mxu0 %v2645_v50  ;;  %1614 = vmatprep.subr.bf16.mxu1 %v2646_v52  ;;  %v2729_v50 = vld [vmem:[%s3309_s16 + $0x494] ss:$8 sps:$4 sm:$0xff]   ;;  %v2727_v52 = vld [vmem:[%s3309_s16 + $0x490] ss:$8 sps:$4 sm:$0xff]  }
  0xcb   : > { %1737 = vmatprep.subr.bf16.mxu0 %v2648_v53  ;;  %v2732_v53 = vld [vmem:[%s3309_s16 + $0x1a4] ss:$8 sps:$4 sm:$0xff]  }
  0xcd   : > { %1615 = vmatpush1.bf16.msra.mxu1 %v2650_v55  ;;  %v2730_v55 = vld [vmem:[%s3309_s16 + $0x1a0] ss:$8 sps:$4 sm:$0xff]  }
  0xce   : > { %1738 = vmatpush1.bf16.msra.mxu0 %v2651_v56  ;;  %1616 = vmatprep.subr.bf16.mxu1 %v2652_v57  ;;  %v2733_v56 = vld [vmem:[%s3309_s16 + $0x4a0] ss:$8 sps:$4 sm:$0xff]   ;;  %v2738_v57 = vld [vmem:[%s3309_s16 + $0x1b4] ss:$8 sps:$4 sm:$0xff]  }
  0xcf   : > { %1739 = vmatprep.subr.bf16.mxu0 %v2654_v58  ;;  %v2741_v58 = vld [vmem:[%s3309_s16 + $0x4b4] ss:$8 sps:$4 sm:$0xff]  }
  0xd1   : > { %1617 = vmatpush1.bf16.msra.mxu1 %v2656_v59  ;;  %v2736_v59 = vld [vmem:[%s3309_s16 + $0x1b0] ss:$8 sps:$4 sm:$0xff]  }
  0xd2   : > { %1740 = vmatpush1.bf16.msra.mxu0 %v2657_v60  ;;  %1618 = vmatprep.subr.bf16.mxu1 %v2658_v61  ;;  %v2739_v60 = vld [vmem:[%s3309_s16 + $0x4b0] ss:$8 sps:$4 sm:$0xff]   ;;  %v2744_v61 = vld [vmem:[%s3309_s16 + $0x1c4] ss:$8 sps:$4 sm:$0xff]  }
  0xd3   : > { %1741 = vmatprep.subr.bf16.mxu0 %v2660_v62  ;;  %v2747_v62 = vld [vmem:[%s3309_s16 + $0x4c4] ss:$8 sps:$4 sm:$0xff]  }
  0xd5   : > { %1619 = vmatpush1.bf16.msra.mxu1 %v2662_v63  ;;  %v2742_v63 = vld [vmem:[%s3309_s16 + $0x1c0] ss:$8 sps:$4 sm:$0xff]  }
  0xd6   : > { %1742 = vmatpush1.bf16.msra.mxu0 %v2663_v0  ;;  %1620 = vmatprep.subr.bf16.mxu1 %v2664_v1  ;;  %v2745_v0 = vld [vmem:[%s3309_s16 + $0x4c0] ss:$8 sps:$4 sm:$0xff]   ;;  %v2750_v1 = vld [vmem:[%s3309_s16 + $0x1d4] ss:$8 sps:$4 sm:$0xff]  }
  0xd7   : > { %1743 = vmatprep.subr.bf16.mxu0 %v2666_v2  ;;  %v2753_v2 = vld [vmem:[%s3309_s16 + $0x4d4] ss:$8 sps:$4 sm:$0xff]  }
  0xd9   : > { %1621 = vmatpush1.bf16.msra.mxu1 %v2668_v3  ;;  %v2748_v3 = vld [vmem:[%s3309_s16 + $0x1d0] ss:$8 sps:$4 sm:$0xff]  }
  0xda   : > { %1744 = vmatpush1.bf16.msra.mxu0 %v2669_v4  ;;  %1631 = vmatprep.subr.bf16.mxu1 %v2672_v5  ;;  %v2751_v4 = vld [vmem:[%s3309_s16 + $0x4d0] ss:$8 sps:$4 sm:$0xff]   ;;  %v2756_v5 = vld [vmem:[%s3309_s16 + $0x1e4] ss:$8 sps:$4 sm:$0xff]  }
  0xdb   : > { %1754 = vmatprep.subr.bf16.mxu0 %v2675_v8  ;;  %v2757_v8 = vld [vmem:[%s3309_s16 + $0x4e0] ss:$8 sps:$4 sm:$0xff]  }
  0xdc   : > { %1623 = vmatmul.mubr.bf16.vlgmr.msra.gmra.mrb[0].mxu1 %v385_v11  ;;  %v2760_v11 = vld [vmem:[%s3309_s16 + $0x1f0] ss:$8 sps:$4 sm:$0xff]  }
  0xdd   : > { %1746 = vmatmul.mubr.bf16.vlgmr.msra.gmra.mrb[0].mxu0 %v391_v12  ;;  %1632 = vmatpush1.bf16.msra.mxu1 %v2670_v9  ;;  %v2762_v9 = vld [vmem:[%s3309_s16 + $0x1f4] ss:$8 sps:$4 sm:$0xff]   ;;  %v2763_v12 = vld [vmem:[%s3309_s16 + $0x4f0] ss:$8 sps:$4 sm:$0xff]  }
  0xde   : > { %1755 = vmatpush1.bf16.msra.mxu0 %v2673_v10  ;;  %1633 = vmatprep.subr.bf16.mxu1 %v2678_v13  ;;  %v2765_v10 = vld [vmem:[%s3309_s16 + $0x4f4] ss:$8 sps:$4 sm:$0xff]   ;;  %v2768_v13 = vld [vmem:[%s3309_s16 + $0x204] ss:$8 sps:$4 sm:$0xff]  }
  0xdf   : > { %1756 = vmatprep.subr.bf16.mxu0 %v2681_v14  ;;  %1663 = vmatprep.mubr.bf16.mxu1 %v388_v37  ;;  %v374_v14 = vld [vmem:[%s3604_s0 + $0x10] sm:$0xff] }
  0xe0   : > { %1786 = vmatprep.mubr.bf16.mxu0 %v394_v42  ;;  %v2792_v37 = vld [vmem:[%s3309_s16 + $0x244] ss:$8 sps:$4 sm:$0xff]   ;;  %v2801_v42 = vld [vmem:[%s3309_s16 + $0x554] ss:$8 sps:$4 sm:$0xff]  }
  0xe1   : > { %1634 = vmatpush1.bf16.msra.mxu1 %v2676_v15  ;;  %v380_v15 = vld [vmem:[%s3604_s0 + $0x40] sm:$0xff] }
  0xe2   : > { %1757 = vmatpush1.bf16.msra.mxu0 %v2679_v16  ;;  %1635 = vmatprep.subr.bf16.mxu1 %v2684_v17  ;;  %v2771_v16 = vld [vmem:[%s3309_s16 + $0x504] ss:$8 sps:$4 sm:$0xff]   ;;  %v2766_v17 = vld [vmem:[%s3309_s16 + $0x200] ss:$8 sps:$4 sm:$0xff]  }
  0xe3   : > { %1758 = vmatprep.subr.bf16.mxu0 %v2687_v18  ;;  %v2769_v18 = vld [vmem:[%s3309_s16 + $0x500] ss:$8 sps:$4 sm:$0xff]  }
  0xe5   : > { %1636 = vmatpush1.bf16.msra.mxu1 %v2682_v19  ;;  %v387_v19 = vpack.c.bf16 %v374_v14, %v374_v14  ;;  %v2855_v14 = vld [vmem:[%s3309_s16 + $0x5e4] ss:$8 sps:$4 sm:$0xff]  }
  0xe6   : > { %1759 = vmatpush1.bf16.msra.mxu0 %v2685_v20  ;;  %1637 = vmatprep.subr.bf16.mxu1 %v2690_v21  ;;  %v393_v20 = vpack.c.bf16 %v380_v15, %v380_v15  ;;  %v2774_v21 = vld [vmem:[%s3309_s16 + $0x214] ss:$8 sps:$4 sm:$0xff]   ;;  %v2850_v15 = vld [vmem:[%s3309_s16 + $0x2e0] ss:$8 sps:$4 sm:$0xff]  }
  0xe7   : > { %1760 = vmatprep.subr.bf16.mxu0 %v2693_v22  ;;  %v2777_v22 = vld [vmem:[%s3309_s16 + $0x514] ss:$8 sps:$4 sm:$0xff]  }
  0xe9   : > { %1638 = vmatpush1.bf16.msra.mxu1 %v2688_v23  ;;  %v377_v23 = vld [vmem:[%s3604_s0 + $0x28] sm:$0xff] }
  0xea   : > { %1761 = vmatpush1.bf16.msra.mxu0 %v2691_v24  ;;  %1639 = vmatprep.subr.bf16.mxu1 %v2696_v25  ;;  %v2772_v24 = vld [vmem:[%s3309_s16 + $0x210] ss:$8 sps:$4 sm:$0xff]  }
  0xeb   : > { %1762 = vmatprep.subr.bf16.mxu0 %v2699_v26  ;;  %v2775_v25 = vld [vmem:[%s3309_s16 + $0x510] ss:$8 sps:$4 sm:$0xff]   ;;  %v390_v26 = vpack.c.bf16 %v377_v23, %v377_v23  ;;  %v2864_v23 = vld [vmem:[%s3309_s16 + $0x604] ss:$8 sps:$4 sm:$0xff]  }
  0xed   : > { %1640 = vmatpush1.bf16.msra.mxu1 %v2694_v27  ;;  %v383_v27 = vld [vmem:[%s3604_s0 + $0x58] sm:$0xff] }
  0xee   : > { %1763 = vmatpush1.bf16.msra.mxu0 %v2697_v28  ;;  %1641 = vmatprep.subr.bf16.mxu1 %v2702_v29  ;;  %v2780_v28 = vld [vmem:[%s3309_s16 + $0x224] ss:$8 sps:$4 sm:$0xff]   ;;  %v396_v29 = vpack.c.bf16 %v383_v27, %v383_v27  ;;  %v2862_v27 = vld [vmem:[%s3309_s16 + $0x600] ss:$8 sps:$4 sm:$0xff]  }
  0xef   : > { %1764 = vmatprep.subr.bf16.mxu0 %v2705_v30  ;;  %v2783_v30 = vld [vmem:[%s3309_s16 + $0x524] ss:$8 sps:$4 sm:$0xff]  }
  0xf1   : > { %1642 = vmatpush1.bf16.msra.mxu1 %v2700_v31  ;;  %v2778_v31 = vld [vmem:[%s3309_s16 + $0x220] ss:$8 sps:$4 sm:$0xff]  }
  0xf2   : > { %1765 = vmatpush1.bf16.msra.mxu0 %v2703_v32  ;;  %1643 = vmatprep.subr.bf16.mxu1 %v2708_v33  ;;  %v2781_v32 = vld [vmem:[%s3309_s16 + $0x520] ss:$8 sps:$4 sm:$0xff]   ;;  %v2786_v33 = vld [vmem:[%s3309_s16 + $0x234] ss:$8 sps:$4 sm:$0xff]  }
  0xf3   : > { %1766 = vmatprep.subr.bf16.mxu0 %v2711_v34  ;;  %v2789_v34 = vld [vmem:[%s3309_s16 + $0x534] ss:$8 sps:$4 sm:$0xff]  }
  0xf5   : > { %1644 = vmatpush1.bf16.msra.mxu1 %v2706_v36  ;;  %v2787_v36 = vld [vmem:[%s3309_s16 + $0x530] ss:$8 sps:$4 sm:$0xff]  }
  0xf6   : > { %1767 = vmatpush1.bf16.msra.mxu0 %v2709_v38  ;;  %1645 = vmatprep.subr.bf16.mxu1 %v2714_v40  ;;  %v2795_v38 = vld [vmem:[%s3309_s16 + $0x544] ss:$8 sps:$4 sm:$0xff]   ;;  %v2793_v40 = vld [vmem:[%s3309_s16 + $0x540] ss:$8 sps:$4 sm:$0xff]  }
  0xf7   : > { %1768 = vmatprep.subr.bf16.mxu0 %v2717_v41  ;;  %v2798_v41 = vld [vmem:[%s3309_s16 + $0x254] ss:$8 sps:$4 sm:$0xff]  }
  0xf9   : > { %1646 = vmatpush1.bf16.msra.mxu1 %v2712_v43  ;;  %v2796_v43 = vld [vmem:[%s3309_s16 + $0x250] ss:$8 sps:$4 sm:$0xff]  }
  0xfa   : > { %1769 = vmatpush1.bf16.msra.mxu0 %v2715_v44  ;;  %1647 = vmatprep.subr.bf16.mxu1 %v2720_v45  ;;  %v2799_v44 = vld [vmem:[%s3309_s16 + $0x550] ss:$8 sps:$4 sm:$0xff]   ;;  %v2804_v45 = vld [vmem:[%s3309_s16 + $0x264] ss:$8 sps:$4 sm:$0xff]  }
  0xfb   : > { %1770 = vmatprep.subr.bf16.mxu0 %v2723_v46  ;;  %v2807_v46 = vld [vmem:[%s3309_s16 + $0x564] ss:$8 sps:$4 sm:$0xff]  }
  0xfd   : > { %1648 = vmatpush1.bf16.msra.mxu1 %v2718_v47  ;;  %v2802_v47 = vld [vmem:[%s3309_s16 + $0x260] ss:$8 sps:$4 sm:$0xff]  }
  0xfe   : > { %1771 = vmatpush1.bf16.msra.mxu0 %v2721_v48  ;;  %1649 = vmatprep.subr.bf16.mxu1 %v2726_v49  ;;  %v2805_v48 = vld [vmem:[%s3309_s16 + $0x560] ss:$8 sps:$4 sm:$0xff]   ;;  %v2810_v49 = vld [vmem:[%s3309_s16 + $0x274] ss:$8 sps:$4 sm:$0xff]  }
  0xff   : > { %1772 = vmatprep.subr.bf16.mxu0 %v2729_v50  ;;  %v2813_v50 = vld [vmem:[%s3309_s16 + $0x574] ss:$8 sps:$4 sm:$0xff]  }
 0x101   : > { %1650 = vmatpush1.bf16.msra.mxu1 %v2724_v51  ;;  %v2808_v51 = vld [vmem:[%s3309_s16 + $0x270] ss:$8 sps:$4 sm:$0xff]  }
 0x102   : > { %1773 = vmatpush1.bf16.msra.mxu0 %v2727_v52  ;;  %1651 = vmatprep.subr.bf16.mxu1 %v2732_v53  ;;  %v2811_v52 = vld [vmem:[%s3309_s16 + $0x570] ss:$8 sps:$4 sm:$0xff]   ;;  %v2816_v53 = vld [vmem:[%s3309_s16 + $0x284] ss:$8 sps:$4 sm:$0xff]  }
 0x103   : > { %1774 = vmatprep.subr.bf16.mxu0 %v2735_v54  ;;  %v2819_v54 = vld [vmem:[%s3309_s16 + $0x584] ss:$8 sps:$4 sm:$0xff]  }
 0x105   : > { %1652 = vmatpush1.bf16.msra.mxu1 %v2730_v55  ;;  %v2814_v55 = vld [vmem:[%s3309_s16 + $0x280] ss:$8 sps:$4 sm:$0xff]  }
 0x106   : > { %1775 = vmatpush1.bf16.msra.mxu0 %v2733_v56  ;;  %1653 = vmatprep.subr.bf16.mxu1 %v2738_v57  ;;  %v2817_v56 = vld [vmem:[%s3309_s16 + $0x580] ss:$8 sps:$4 sm:$0xff]   ;;  %v2822_v57 = vld [vmem:[%s3309_s16 + $0x294] ss:$8 sps:$4 sm:$0xff]  }
 0x107   : > { %1776 = vmatprep.subr.bf16.mxu0 %v2741_v58  ;;  %v2825_v58 = vld [vmem:[%s3309_s16 + $0x594] ss:$8 sps:$4 sm:$0xff]  }
 0x109   : > { %1654 = vmatpush1.bf16.msra.mxu1 %v2736_v59  ;;  %v2820_v59 = vld [vmem:[%s3309_s16 + $0x290] ss:$8 sps:$4 sm:$0xff]  }
 0x10a   : > { %1777 = vmatpush1.bf16.msra.mxu0 %v2739_v60  ;;  %1655 = vmatprep.subr.bf16.mxu1 %v2744_v61  ;;  %v2823_v60 = vld [vmem:[%s3309_s16 + $0x590] ss:$8 sps:$4 sm:$0xff]   ;;  %v2828_v61 = vld [vmem:[%s3309_s16 + $0x2a4] ss:$8 sps:$4 sm:$0xff]  }
 0x10b   : > { %1778 = vmatprep.subr.bf16.mxu0 %v2747_v62  ;;  %v2831_v62 = vld [vmem:[%s3309_s16 + $0x5a4] ss:$8 sps:$4 sm:$0xff]  }
 0x10d   : > { %1656 = vmatpush1.bf16.msra.mxu1 %v2742_v63  ;;  %v2826_v63 = vld [vmem:[%s3309_s16 + $0x2a0] ss:$8 sps:$4 sm:$0xff]  }
 0x10e   : > { %1779 = vmatpush1.bf16.msra.mxu0 %v2745_v0  ;;  %1657 = vmatprep.subr.bf16.mxu1 %v2750_v1  ;;  %v2829_v0 = vld [vmem:[%s3309_s16 + $0x5a0] ss:$8 sps:$4 sm:$0xff]   ;;  %v2834_v1 = vld [vmem:[%s3309_s16 + $0x2b4] ss:$8 sps:$4 sm:$0xff]  }
 0x10f   : > { %1780 = vmatprep.subr.bf16.mxu0 %v2753_v2  ;;  %v2837_v2 = vld [vmem:[%s3309_s16 + $0x5b4] ss:$8 sps:$4 sm:$0xff]  }
 0x111   : > { %1658 = vmatpush1.bf16.msra.mxu1 %v2748_v3  ;;  %v2832_v3 = vld [vmem:[%s3309_s16 + $0x2b0] ss:$8 sps:$4 sm:$0xff]  }
 0x112   : > { %1781 = vmatpush1.bf16.msra.mxu0 %v2751_v4  ;;  %1659 = vmatprep.subr.bf16.mxu1 %v2756_v5  ;;  %v2835_v4 = vld [vmem:[%s3309_s16 + $0x5b0] ss:$8 sps:$4 sm:$0xff]   ;;  %v2840_v5 = vld [vmem:[%s3309_s16 + $0x2c4] ss:$8 sps:$4 sm:$0xff]  }
 0x113   : > { %1782 = vmatprep.subr.bf16.mxu0 %v2759_v6  ;;  %v2843_v6 = vld [vmem:[%s3309_s16 + $0x5c4] ss:$8 sps:$4 sm:$0xff]  }
 0x115   : > { %1660 = vmatpush1.bf16.msra.mxu1 %v2754_v7  ;;  %v2838_v7 = vld [vmem:[%s3309_s16 + $0x2c0] ss:$8 sps:$4 sm:$0xff]  }
 0x116   : > { %1783 = vmatpush1.bf16.msra.mxu0 %v2757_v8  ;;  %1661 = vmatprep.subr.bf16.mxu1 %v2762_v9  ;;  %v2841_v8 = vld [vmem:[%s3309_s16 + $0x5c0] ss:$8 sps:$4 sm:$0xff]   ;;  %v2846_v9 = vld [vmem:[%s3309_s16 + $0x2d4] ss:$8 sps:$4 sm:$0xff]  }
 0x117   : > { %1784 = vmatprep.subr.bf16.mxu0 %v2765_v10  ;;  %v2849_v10 = vld [vmem:[%s3309_s16 + $0x5d4] ss:$8 sps:$4 sm:$0xff]  }
 0x119   : > { %1662 = vmatpush1.bf16.msra.mxu1 %v2760_v11  ;;  %v2844_v11 = vld [vmem:[%s3309_s16 + $0x2d0] ss:$8 sps:$4 sm:$0xff]  }
 0x11a   : > { %1785 = vmatpush1.bf16.msra.mxu0 %v2763_v12  ;;  %1672 = vmatprep.subr.bf16.mxu1 %v2768_v13  ;;  %v2847_v12 = vld [vmem:[%s3309_s16 + $0x5d0] ss:$8 sps:$4 sm:$0xff]   ;;  %v2852_v13 = vld [vmem:[%s3309_s16 + $0x2e4] ss:$8 sps:$4 sm:$0xff]  }
 0x11b   : > { %1795 = vmatprep.subr.bf16.mxu0 %v2771_v16  ;;  %v2853_v16 = vld [vmem:[%s3309_s16 + $0x5e0] ss:$8 sps:$4 sm:$0xff]  }
 0x11c   : > { %1664 = vmatmul.mubr.bf16.vlgmr.msra.gmra.mrb[0].mxu1 %v387_v19  ;;  %v2856_v19 = vld [vmem:[%s3309_s16 + $0x2f0] ss:$8 sps:$4 sm:$0xff]  }
 0x11d   : > { %1787 = vmatmul.mubr.bf16.vlgmr.msra.gmra.mrb[0].mxu0 %v393_v20  ;;  %1673 = vmatpush1.bf16.msra.mxu1 %v2766_v17  ;;  %v2858_v17 = vld [vmem:[%s3309_s16 + $0x2f4] ss:$8 sps:$4 sm:$0xff]   ;;  %v2859_v20 = vld [vmem:[%s3309_s16 + $0x5f0] ss:$8 sps:$4 sm:$0xff]  }
 0x11e   : > { %1796 = vmatpush1.bf16.msra.mxu0 %v2769_v18  ;;  %1674 = vmatprep.subr.bf16.mxu1 %v2774_v21  ;;  %v2861_v18 = vld [vmem:[%s3309_s16 + $0x5f4] ss:$8 sps:$4 sm:$0xff]  }
 0x11f   : > { %1797 = vmatprep.subr.bf16.mxu0 %v2777_v22  ;;  %1704 = vmatprep.mubr.bf16.mxu1 %v390_v26  ;;  %v376_v21 = vld [vmem:[%s3604_s0 + $0x20] sm:$0xff]  ;;  %v382_v22 = vld [vmem:[%s3604_s0 + $0x50] sm:$0xff] }
 0x120   : > { %1827 = vmatprep.mubr.bf16.mxu0 %v396_v29  ;;  %v395_v26 = vpack.c.bf16 %v382_v22, %v382_v22  ;;  %v2869_v29 = vld [vmem:[%s3323_s2] sm:$0xff]  }
 0x121   : > { %1675 = vmatpush1.bf16.msra.mxu1 %v2772_v24  ;;  %v2868_v24 = vld [vmem:[%s3323_s2 + $0x40] sm:$0xff]  }
 0x122   : > { %1798 = vmatpush1.bf16.msra.mxu0 %v2775_v25  ;;  %1676 = vmatprep.subr.bf16.mxu1 %v2780_v28  ;;  %v389_v25 = vpack.c.bf16 %v376_v21, %v376_v21  ;;  %v2867_v28 = vld [vmem:[%s3309_s16 + $0x614] ss:$8 sps:$4 sm:$0xff]  }
 0x123   : > { %1799 = vmatprep.subr.bf16.mxu0 %v2783_v30  ;;  %v2870_v30 = vld [vmem:[%s3323_s2 + $0x48] sm:$0xff]  }
 0x125   : > { %1677 = vmatpush1.bf16.msra.mxu1 %v2778_v31  ;;  %v2865_v31 = vld [vmem:[%s3309_s16 + $0x610] ss:$8 sps:$4 sm:$0xff]  }
 0x126   : > { %1800 = vmatpush1.bf16.msra.mxu0 %v2781_v32  ;;  %1678 = vmatprep.subr.bf16.mxu1 %v2786_v33  ;;  %v3072_v32 = vmov 0   ;;  %v2871_v33 = vld [vmem:[%s3323_s2 + $0x8] sm:$0xff]  }
 0x127   : > { %1801 = vmatprep.subr.bf16.mxu0 %v2789_v34  ;;  %v2872_v34 = vld [vmem:[%s3323_s2 + $0x50] sm:$0xff]  }
 0x129   : > { %1679 = vmatpush1.bf16.msra.mxu1 %v2784_v35  ;;  %v384_v35 = vld [vmem:[%s3604_s0 + $0x60] sm:$0xff] }
 0x12a   : > { %1802 = vmatpush1.bf16.msra.mxu0 %v2787_v36  ;;  %1680 = vmatprep.subr.bf16.mxu1 %v2792_v37  ;;  %v2873_v36 = vld [vmem:[%s3323_s2 + $0x10] sm:$0xff]   ;;  %v397_v37 = vpack.c.bf16 %v384_v35, %v384_v35 }
 0x12b   : > { %1803 = vmatprep.subr.bf16.mxu0 %v2795_v38  ;;  %v2874_v38 = vld [vmem:[%s3323_s2 + $0x58] sm:$0xff]  }
 0x12d   : > { %1681 = vmatpush1.bf16.msra.mxu1 %v2790_v39  ;;  %v2875_v39 = vld [vmem:[%s3323_s2 + $0x18] sm:$0xff]  }
 0x12e   : > { %1804 = vmatpush1.bf16.msra.mxu0 %v2793_v40  ;;  %1682 = vmatprep.subr.bf16.mxu1 %v2798_v41  ;;  %v2876_v40 = vld [vmem:[%s3323_s2 + $0x60] sm:$0xff]  }
 0x12f   : > { %1805 = vmatprep.subr.bf16.mxu0 %v2801_v42  ;;  %v2877_v41 = vld [vmem:[%s3323_s2 + $0x20] sm:$0xff]   ;;  %v2878_v42 = vld [vmem:[%s3323_s2 + $0x68] sm:$0xff]  }
 0x131   : > { %1683 = vmatpush1.bf16.msra.mxu1 %v2796_v43  ;;  %v2879_v43 = vld [vmem:[%s3323_s2 + $0x28] sm:$0xff]  }
 0x132   : > { %1806 = vmatpush1.bf16.msra.mxu0 %v2799_v44  ;;  %1684 = vmatprep.subr.bf16.mxu1 %v2804_v45  ;;  %v2880_v44 = vld [vmem:[%s3323_s2 + $0x70] sm:$0xff]  }
 0x133   : > { %1807 = vmatprep.subr.bf16.mxu0 %v2807_v46  ;;  %v2881_v45 = vld [vmem:[%s3323_s2 + $0x30] sm:$0xff]   ;;  %v2882_v46 = vld [vmem:[%s3323_s2 + $0x78] sm:$0xff]  }
 0x135   : > { %1685 = vmatpush1.bf16.msra.mxu1 %v2802_v47  ;;  %v2883_v47 = vld [vmem:[%s3323_s2 + $0x38] sm:$0xff]  }
 0x136   : > { %1808 = vmatpush1.bf16.msra.mxu0 %v2805_v48  ;;  %1686 = vmatprep.subr.bf16.mxu1 %v2810_v49  ;;  %v596_v48 = vlaneseq }
 0x137   : > { %1809 = vmatprep.subr.bf16.mxu0 %v2813_v50 }
 0x138   : > { %v597_v49 = vshrl.u32 %v596_v48, 7 }
 0x139   : > { %1687 = vmatpush1.bf16.msra.mxu1 %v2808_v51 }
 0x13a   : > { %1810 = vmatpush1.bf16.msra.mxu0 %v2811_v52  ;;  %1688 = vmatprep.subr.bf16.mxu1 %v2816_v53  ;;  %v598_v53 = vsub.s32 0, %v597_v49 }
 0x13b   : > { %1811 = vmatprep.subr.bf16.mxu0 %v2819_v54 }
 0x13d   : > { %1689 = vmatpush1.bf16.msra.mxu1 %v2814_v55  ;;  %v594_v55 = vld [vmem:[%s3317_s8] sm:$0x3] }
 0x13e   : > { %1812 = vmatpush1.bf16.msra.mxu0 %v2817_v56  ;;  %1690 = vmatprep.subr.bf16.mxu1 %v2822_v57  ;;  %v602_v56 = vsub.s32 1, %v597_v49  ;;  %v599_v57 = vrot.slane %v594_v55, %v598_v53 }
 0x13f   : > { %1813 = vmatprep.subr.bf16.mxu0 %v2825_v58 }
 0x140   : > { %v603_v58 = vrot.slane %v594_v55, %v602_v56 }
 0x141   : > { %1691 = vmatpush1.bf16.msra.mxu1 %v2820_v59 }
 0x142   : > { %1814 = vmatpush1.bf16.msra.mxu0 %v2823_v60  ;;  %1692 = vmatprep.subr.bf16.mxu1 %v2828_v61 }
 0x143   : > { %1815 = vmatprep.subr.bf16.mxu0 %v2831_v62 }
 0x145   : > { %1693 = vmatpush1.bf16.msra.mxu1 %v2826_v63 }
 0x146   : > { %1816 = vmatpush1.bf16.msra.mxu0 %v2829_v0  ;;  %1694 = vmatprep.subr.bf16.mxu1 %v2834_v1 }
 0x147   : > { %1817 = vmatprep.subr.bf16.mxu0 %v2837_v2 }
 0x149   : > { %1695 = vmatpush1.bf16.msra.mxu1 %v2832_v3 }
 0x14a   : > { %1818 = vmatpush1.bf16.msra.mxu0 %v2835_v4  ;;  %1696 = vmatprep.subr.bf16.mxu1 %v2840_v5 }
 0x14b   : > { %1819 = vmatprep.subr.bf16.mxu0 %v2843_v6 }
 0x14d   : > { %1697 = vmatpush1.bf16.msra.mxu1 %v2838_v7 }
 0x14e   : > { %1820 = vmatpush1.bf16.msra.mxu0 %v2841_v8  ;;  %1698 = vmatprep.subr.bf16.mxu1 %v2846_v9  ;;  %v1879_v8 = vld [vmem:[#allocation2] sm:$0xff] }
 0x14f   : > { %1821 = vmatprep.subr.bf16.mxu0 %v2849_v10 }
 0x151   : > { %1699 = vmatpush1.bf16.msra.mxu1 %v2844_v11 }
 0x152   : > { %1822 = vmatpush1.bf16.msra.mxu0 %v2847_v12  ;;  %1700 = vmatprep.subr.bf16.mxu1 %v2852_v13 }
 0x153   : > { %1823 = vmatprep.subr.bf16.mxu0 %v2855_v14 }
 0x155   : > { %1701 = vmatpush1.bf16.msra.mxu1 %v2850_v15  ;;  %v2436_v15 = vld [vmem:[#allocation8] ss:$0 sm:$0xff] (!%p2435_p0) }
 0x156   : > { %1824 = vmatpush1.bf16.msra.mxu0 %v2853_v16  ;;  %1702 = vmatprep.subr.bf16.mxu1 %v2858_v17 }
 0x157   : > { %1825 = vmatprep.subr.bf16.mxu0 %v2861_v18 }
 0x159   : > { %1703 = vmatpush1.bf16.msra.mxu1 %v2856_v19 }
 0x15a   : > { %1826 = vmatpush1.bf16.msra.mxu0 %v2859_v20  ;;  %2443 = vmatprep.subr.bf16.mxu1 %v2868_v24 }
 0x15b   : > { %1836 = vmatprep.subr.bf16.mxu0 %v2864_v23 }
 0x15c   : > { %1705 = vmatmul.mubr.bf16.vlgmr.msra.gmra.mrb[0].mxu1 %v389_v25 }
 0x15d   : > { %1828 = vmatmul.mubr.bf16.vlgmr.msra.gmra.mrb[0].mxu0 %v395_v26  ;;  %2444 = vmatpush3.bf16.msra.mxu1 %v2869_v29 }
 0x15e   : > { %1837 = vmatpush1.bf16.msra.mxu0 %v2862_v27  ;;  %1868 = vmatprep.mubr.bf16.mxu0 %v3072_v32 }
 0x15f   : > { %1838 = vmatprep.subr.bf16.mxu0 %v2867_v28  ;;  %2445 = vmatprep.subr.bf16.mxu1 %v2870_v30 }
 0x161   : > { %2446 = vmatpush3.bf16.msra.mxu1 %v2871_v33 }
 0x162   : > { %1839 = vmatpush1.bf16.msra.mxu0 %v2865_v31  ;;  %2447 = vmatprep.subr.bf16.mxu1 %v2872_v34 }
 0x165   : > { %2448 = vmatpush3.bf16.msra.mxu1 %v2873_v36 }
 0x166   : > { %2449 = vmatprep.subr.bf16.mxu1 %v2874_v38 }
 0x169   : > { %2418 = vmatmul.mubr.msk.bf16.vlgmr.msra.gmra.mrb[0].mxu0 %vm1586_vm0, %v397_v37  ;;  %2450 = vmatpush3.bf16.msra.mxu1 %v2875_v39 }
 0x16a   : > { %2451 = vmatprep.subr.bf16.mxu1 %v2876_v40 }
 0x16d   : > { %2452 = vmatpush3.bf16.msra.mxu1 %v2877_v41 }
 0x16e   : > { %2453 = vmatprep.subr.bf16.mxu1 %v2878_v42 }
 0x171   : > { %2454 = vmatpush3.bf16.msra.mxu1 %v2879_v43 }
 0x172   : > { %2455 = vmatprep.subr.bf16.mxu1 %v2880_v44 }
 0x175   : > { %2456 = vmatpush3.bf16.msra.mxu1 %v2881_v45 }
 0x176   : > { %2457 = vmatprep.subr.bf16.mxu1 %v2882_v46 }
 0x179   : > { %2458 = vmatpush3.bf16.msra.mxu1 %v2883_v47 }
 0x22f   : > { %v1706_v50 = vpop.f32.mrb[0].mxu1 }
 0x230   : > { %v1708_v51 = vpop.f32.mrb[1].mxu1  ;;  %v2465_v59 = vadd.f32 %v1706_v50, %v599_v57 }
 0x231   : > { %v1710_v52 = vpop.f32.mrb[2].mxu1  ;;  %v2467_v60 = vadd.f32 %v1708_v51, %v603_v58 }
 0x232   : > { %v1711_v54 = vpop.f32.mrb[3].mxu1 }
 0x23c   : > { %v1870_v61 = vpop.f32.mrb[0].mxu0 }
 0x23d   : > { %v2466_v62 = vadd.f32 %v2465_v59, %v1870_v61  ;;  %v1872_v63 = vpop.f32.mrb[1].mxu0 }
 0x23e   : > { %v2468_v0 = vadd.f32 %v2467_v60, %v1872_v63  ;;  %v1874_v1 = vpop.f32.mrb[2].mxu0 }
 0x23f   : > { %v1877_v2 = vmax.f32 %v2466_v62, 0.0  ;;  %v1875_v3 = vpop.f32.mrb[3].mxu0 }
 0x240   : > { %v1878_v4 = vmax.f32 %v2468_v0, 0.0 }
 0x241   : > { %v1880_v6 = vpack.c.bf16 %v1877_v2, %v1877_v2 }
 0x242   : > { %v1881_v5 = vpack.c.bf16 %v1878_v4, %v1878_v4 }
 0x244   : > { %2042 = vmatprep.mubr.bf16.mxu1 %v1881_v5 }
 0x245   : > { %2043 = vmatmul.mubr.bf16.vlgmr.msra.gmra.mrb[4].mxu1 %v1880_v6 }
 0x318   : > { %v2459_v7 = vpop.f32.mrb[4].mxu1  ;;  %2055 = sbr.rel (%p2435_p0) target bundleno = 809 (0x329), region = 64 }
 0x319   : > { %v2460_v9 = vpop.f32.mrb[5].mxu1 }
 0x31a   : > { %v2461_v10 = vadd.f32 %v2460_v9, %v2459_v7  ;;  %v2462_v11 = vpop.f32.mrb[6].mxu1 }
 0x31b   : > { %v2463_v12 = vpop.f32.mrb[7].mxu1 }
 0x31c   : > { %v2050_v13 = vadd.f32 %v2461_v10, %v1879_v8 }
 0x31e   : > { %2051 = vst [vmem:[#allocation2] sm:$0xff] %v2050_v13 }
 0x325   : > { %v2056_v14 = vld [vmem:[#allocation2] sm:$0xff] }
 0x326   : > { %v2064_v16 = vadd.f32 %v2436_v15, %v2056_v14 }
 0x328   : > { %2065 = vst [vmem:[%s3609_s5] sm:$0xff] %v2064_v16 }
 0x329 PF: > { %s22_s23 = sadd.s32 1, %s3060_s23   ;;  %s3637_s2 = sld [smem:[#allocation14_spill]] }
 0x32a   : > { %p19_p1 = scmp.ge.s32.totalorder %s22_s23, 6   ;;  %s3638_s30 = sld [smem:[#allocation13_spill]] }
 0x32b   : > { %s3639_s18 = smov %s3044_s19  ;;  %s3640_s19 = smov %s3048_s20 }
 0x32c   : > { %s3642_s21 = smov %s3056_s22  ;;  %21 = sbr.rel (!%p19_p1) target bundleno = 9 (0x9), region = 119 }
 0x32f   : > { %s3641_s20 = smov %s3637_s2 }
 0x330   : > { %s3643_s22 = smov %s3638_s30 }
 0x333   :  { %2085 = vsyncpa [#allocation4], 1 }
 0x334   :  { %2087 = vsyncpa [#allocation4 + $0x1], 1 }
 0x335   :  { %2088 = vsyncpa [#allocation6], 1 }
 0x336   :  { %2090 = vsyncpa [#allocation6 + $0x1], 1 }
 0x337   :  { %2091 = vsyncpa [#allocation9], 1 }

</bundles_post_ra>
